<compile_context>
chip_gen: v6e
topology: v6e:2x2x1
jax: 0.10.0
libtpu: 0.0.40
codegen_flags: <defaults>
</compile_context>

<pallas_src>
import jax
import jax.numpy as jnp
from jax import lax
from jax.experimental import pallas as pl
from jax.experimental.pallas import tpu as pltpu


_TAPS = tuple((oy, ox) for oy in (-1, 0, 1) for ox in (-1, 0, 1))


def _make_kernel(Cin, Cout, H, W):
    HW = H * W
    K = 9 * Cin + 1  # 9 taps * Cin channels + 1 bias row

    def kernel(x_ref, w_ref, m_ref, o_ref, col_ref):
        # x_ref  : (1, Cin, HW)  current sample, lane-dense (spatial on lanes)
        # w_ref  : (Cout, K)     im2col weights, bias folded into last column
        # m_ref  : (9, HW)       0/1 boundary masks per tap
        # o_ref  : (1, Cout, HW) output block
        # col_ref: (K, HW)       VMEM scratch: im2col patch matrix
        x = x_ref[0]                                        # (Cin, HW) f32
        for t, (oy, ox) in enumerate(_TAPS):
            # out[p] needs x[p + oy*W + ox]; roll by the negated offset and
            # zero the positions that would have read outside the image.
            shift = (-(oy * W + ox)) % HW
            xs = pltpu.roll(x, shift=shift, axis=1) if shift else x
            if (oy, ox) != (0, 0):
                xs = xs * m_ref[t:t + 1, :]                 # VPU mask (lane-dense)
            col_ref[t * Cin:(t + 1) * Cin, :] = xs
        # Bias row of ones. Written every step on purpose: scratch is per-core
        # and with "parallel" semantics a core may never execute program_id==0.
        col_ref[9 * Cin:K, :] = jnp.ones((1, HW), jnp.float32)
        acc = lax.dot_general(                              # single MXU pass, K=9*Cin+1
            w_ref[...], col_ref[...],
            dimension_numbers=(((1,), (0,)), ((), ())),
            preferred_element_type=jnp.float32)             # (Cout, HW)
        o_ref[0] = acc.astype(o_ref.dtype)

    return kernel


def _tap_masks(H, W, dtype):
    """(9, H*W) 0/1 masks: 1 where tap (oy, ox) reads inside the image."""
    hh = jnp.arange(H).reshape(H, 1)
    ww = jnp.arange(W).reshape(1, W)
    rows = []
    for oy, ox in _TAPS:
        m = (hh + oy >= 0) & (hh + oy < H) & (ww + ox >= 0) & (ww + ox < W)
        rows.append(m.reshape(H * W))
    return jnp.stack(rows).astype(dtype)


def conv2d_3x3_same_nchw(x_nchw, weight_oihw, bias):
    """3x3, stride-1, padding-1 conv (PyTorch Conv2d semantics). NCHW in/out."""
    N, Cin, H, W = x_nchw.shape
    Cout = weight_oihw.shape[0]
    HW = H * W
    Kdim = 9 * Cin + 1

    # Free reshape: spatial dims collapse onto the lane axis (no data movement).
    x_flat = x_nchw.reshape(N, Cin, HW)
    # OIHW -> (Cout, dy, dx, Cin) -> (Cout, 9*Cin); append bias as last column.
    w_col = jnp.transpose(weight_oihw, (0, 2, 3, 1)).reshape(Cout, 9 * Cin)
    w_aug = jnp.concatenate([w_col, bias.reshape(Cout, 1)], axis=1)
    masks = _tap_masks(H, W, x_nchw.dtype)

    kernel = _make_kernel(Cin, Cout, H, W)

    cost = pl.CostEstimate(
        flops=2 * N * HW * 9 * Cin * Cout,
        transcendentals=0,
        bytes_accessed=4 * (N * Cin * HW + N * Cout * HW + Cout * Kdim + 9 * HW),
    )

    out_flat = pl.pallas_call(
        kernel,
        out_shape=jax.ShapeDtypeStruct((N, Cout, HW), x_nchw.dtype),
        grid=(N,),
        in_specs=[
            pl.BlockSpec((1, Cin, HW), lambda n: (n, 0, 0)),
            pl.BlockSpec((Cout, Kdim), lambda n: (0, 0)),
            pl.BlockSpec((9, HW), lambda n: (0, 0)),
        ],
        out_specs=pl.BlockSpec((1, Cout, HW), lambda n: (n, 0, 0)),
        scratch_shapes=[pltpu.VMEM((Kdim, HW), jnp.float32)],
        compiler_params=pltpu.CompilerParams(
            dimension_semantics=("parallel",),      # shard batch over v7x's 2 TCs
            vmem_limit_bytes=32 * 1024 * 1024,
        ),
        cost_estimate=cost,
    )(x_flat, w_aug, masks)
    # TODO(synk): for very large H*W, additionally tile the grid over H with a
    # +/-1-row halo so a single sample slab never exceeds v7x's 64 MiB VMEM.
    return out_flat.reshape(N, Cout, H, W)


class BaselineModelPallas:
    """JAX/Pallas equivalent of the PyTorch BaselineModel (Conv2d 3x3, pad=1)."""

    def __init__(self, in_channels=3, out_channels=3, key=jax.random.PRNGKey(42)):
        self.in_channels = in_channels
        self.out_channels = out_channels
        kw, kb = jax.random.split(key)
        # PyTorch Conv2d-style init bounds; deterministic values, OIHW layout.
        fan_in = in_channels * 3 * 3
        bound = 1.0 / (fan_in ** 0.5)
        self.weight_oihw = jax.random.uniform(
            kw, (out_channels, in_channels, 3, 3), jnp.float32,
            minval=-bound, maxval=bound)
        self.bias = jax.random.uniform(
            kb, (out_channels,), jnp.float32, minval=-bound, maxval=bound)

    def __call__(self, sample_nchw, timestep, return_dict=True):
        # timestep is unused by the reference forward pass (kept for API parity).
        y = conv2d_3x3_same_nchw(sample_nchw, self.weight_oihw, self.bias)
        if return_dict:
            return type("Output", (), {"sample": y})()
        return y


if __name__ == "__main__":
    key = jax.random.PRNGKey(0)
    k_x, k_params = jax.random.split(key)

    N, Cin, H, W = 2, 3, 16, 16
    sample = jax.random.normal(k_x, (N, Cin, H, W), jnp.float32)  # NCHW
    timestep = jnp.array(10, jnp.int32)

    model = BaselineModelPallas(in_channels=Cin, out_channels=3, key=k_params)
    out = model(sample, timestep, return_dict=True)
    y = jax.block_until_ready(out.sample)

    # Reference: XLA conv (NCHW, SAME padding, OIHW weights) + bias.
    ref = lax.conv_general_dilated(
        sample, model.weight_oihw, window_strides=(1, 1), padding="SAME",
        dimension_numbers=("NCHW", "OIHW", "NCHW"),
    ) + model.bias.reshape(1, -1, 1, 1)
    ref = jax.block_until_ready(ref)

    assert y.shape == (N, 3, H, W), y.shape
    assert jnp.allclose(y, ref, atol=1e-4, rtol=1e-4), float(jnp.abs(y - ref).max())
    print("KERNEL_OK")
</pallas_src>

<mosaic_0001>
module attributes {stable_mosaic.version = 11 : i64} {
  func.func @kernel(%arg0: i32, %arg1: memref<1x3x256xf32, #tpu.memory_space<vmem>>, %arg2: memref<3x28xf32, #tpu.memory_space<vmem>>, %arg3: memref<9x256xf32, #tpu.memory_space<vmem>>, %arg4: memref<1x3x256xf32, #tpu.memory_space<vmem>>, %arg5: memref<28x256xf32, #tpu.memory_space<vmem>>) attributes {dimension_semantics = [#tpu.dimension_semantics<parallel>], iteration_bounds = array<i64: 2>, scalar_prefetch = 0 : i64, scratch_operands = 1 : i64, tpu.core_type = #tpu.core_type<tc>, window_params = [{transform_indices = @transform_0, window_bounds = array<i64: 1, 3, 256>}, {pipeline_mode = #tpu.pipeline_mode<synchronous>, transform_indices = @transform_1, window_bounds = array<i64: 3, 28>}, {pipeline_mode = #tpu.pipeline_mode<synchronous>, transform_indices = @transform_2, window_bounds = array<i64: 9, 256>}, {transform_indices = @transform_3, window_bounds = array<i64: 1, 3, 256>}]} {
    %c0 = arith.constant 0 : index
    %c0_0 = arith.constant 0 : index
    %c0_1 = arith.constant 0 : index
    %0 = vector.load %arg1[%c0, %c0_0, %c0_1] : memref<1x3x256xf32, #tpu.memory_space<vmem>>, vector<1x3x256xf32>
    %1 = vector.shape_cast %0 : vector<1x3x256xf32> to vector<3x256xf32>
    %c17_i32 = arith.constant 17 : i32
    %2 = tpu.dynamic_rotate %1 by %c17_i32 dim 1 : vector<3x256xf32>, i32 -> vector<3x256xf32>
    %c0_2 = arith.constant 0 : index
    %c0_3 = arith.constant 0 : index
    %3 = vector.load %arg3[%c0_2, %c0_3] : memref<9x256xf32, #tpu.memory_space<vmem>>, vector<1x256xf32>
    %4 = vector.broadcast %3 : vector<1x256xf32> to vector<3x256xf32>
    %5 = arith.mulf %2, %4 : vector<3x256xf32>
    %c0_4 = arith.constant 0 : index
    %c0_5 = arith.constant 0 : index
    %6 = vector.load %arg5[%c0_4, %c0_5] : memref<28x256xf32, #tpu.memory_space<vmem>>, vector<3x256xf32>
    tpu.vector_store %arg5[%c0_4, %c0_5], %5 {strides = array<i32>} : memref<28x256xf32, #tpu.memory_space<vmem>>, vector<3x256xf32>,
    %c16_i32 = arith.constant 16 : i32
    %7 = tpu.dynamic_rotate %1 by %c16_i32 dim 1 : vector<3x256xf32>, i32 -> vector<3x256xf32>
    %c1 = arith.constant 1 : index
    %c0_6 = arith.constant 0 : index
    %8 = vector.load %arg3[%c1, %c0_6] : memref<9x256xf32, #tpu.memory_space<vmem>>, vector<1x256xf32>
    %9 = vector.broadcast %8 : vector<1x256xf32> to vector<3x256xf32>
    %10 = arith.mulf %7, %9 : vector<3x256xf32>
    %c3 = arith.constant 3 : index
    %c0_7 = arith.constant 0 : index
    %11 = vector.load %arg5[%c3, %c0_7] : memref<28x256xf32, #tpu.memory_space<vmem>>, vector<3x256xf32>
    tpu.vector_store %arg5[%c3, %c0_7], %10 {strides = array<i32>} : memref<28x256xf32, #tpu.memory_space<vmem>>, vector<3x256xf32>,
    %c15_i32 = arith.constant 15 : i32
    %12 = tpu.dynamic_rotate %1 by %c15_i32 dim 1 : vector<3x256xf32>, i32 -> vector<3x256xf32>
    %c2 = arith.constant 2 : index
    %c0_8 = arith.constant 0 : index
    %13 = vector.load %arg3[%c2, %c0_8] : memref<9x256xf32, #tpu.memory_space<vmem>>, vector<1x256xf32>
    %14 = vector.broadcast %13 : vector<1x256xf32> to vector<3x256xf32>
    %15 = arith.mulf %12, %14 : vector<3x256xf32>
    %c6 = arith.constant 6 : index
    %c0_9 = arith.constant 0 : index
    %16 = vector.load %arg5[%c6, %c0_9] : memref<28x256xf32, #tpu.memory_space<vmem>>, vector<3x256xf32>
    tpu.vector_store %arg5[%c6, %c0_9], %15 {strides = array<i32>} : memref<28x256xf32, #tpu.memory_space<vmem>>, vector<3x256xf32>,
    %c1_i32 = arith.constant 1 : i32
    %17 = tpu.dynamic_rotate %1 by %c1_i32 dim 1 : vector<3x256xf32>, i32 -> vector<3x256xf32>
    %c3_10 = arith.constant 3 : index
    %c0_11 = arith.constant 0 : index
    %18 = vector.load %arg3[%c3_10, %c0_11] : memref<9x256xf32, #tpu.memory_space<vmem>>, vector<1x256xf32>
    %19 = vector.broadcast %18 : vector<1x256xf32> to vector<3x256xf32>
    %20 = arith.mulf %17, %19 : vector<3x256xf32>
    %c9 = arith.constant 9 : index
    %c0_12 = arith.constant 0 : index
    %21 = vector.load %arg5[%c9, %c0_12] : memref<28x256xf32, #tpu.memory_space<vmem>>, vector<3x256xf32>
    tpu.vector_store %arg5[%c9, %c0_12], %20 {strides = array<i32>} : memref<28x256xf32, #tpu.memory_space<vmem>>, vector<3x256xf32>,
    %c12 = arith.constant 12 : index
    %c0_13 = arith.constant 0 : index
    %22 = vector.load %arg5[%c12, %c0_13] : memref<28x256xf32, #tpu.memory_space<vmem>>, vector<3x256xf32>
    tpu.vector_store %arg5[%c12, %c0_13], %1 {strides = array<i32>} : memref<28x256xf32, #tpu.memory_space<vmem>>, vector<3x256xf32>,
    %c255_i32 = arith.constant 255 : i32
    %23 = tpu.dynamic_rotate %1 by %c255_i32 dim 1 : vector<3x256xf32>, i32 -> vector<3x256xf32>
    %c5 = arith.constant 5 : index
    %c0_14 = arith.constant 0 : index
    %24 = vector.load %arg3[%c5, %c0_14] : memref<9x256xf32, #tpu.memory_space<vmem>>, vector<1x256xf32>
    %25 = vector.broadcast %24 : vector<1x256xf32> to vector<3x256xf32>
    %26 = arith.mulf %23, %25 : vector<3x256xf32>
    %c15 = arith.constant 15 : index
    %c0_15 = arith.constant 0 : index
    %27 = vector.load %arg5[%c15, %c0_15] : memref<28x256xf32, #tpu.memory_space<vmem>>, vector<3x256xf32>
    tpu.vector_store %arg5[%c15, %c0_15], %26 {strides = array<i32>} : memref<28x256xf32, #tpu.memory_space<vmem>>, vector<3x256xf32>,
    %c241_i32 = arith.constant 241 : i32
    %28 = tpu.dynamic_rotate %1 by %c241_i32 dim 1 : vector<3x256xf32>, i32 -> vector<3x256xf32>
    %c6_16 = arith.constant 6 : index
    %c0_17 = arith.constant 0 : index
    %29 = vector.load %arg3[%c6_16, %c0_17] : memref<9x256xf32, #tpu.memory_space<vmem>>, vector<1x256xf32>
    %30 = vector.broadcast %29 : vector<1x256xf32> to vector<3x256xf32>
    %31 = arith.mulf %28, %30 : vector<3x256xf32>
    %c18 = arith.constant 18 : index
    %c0_18 = arith.constant 0 : index
    %32 = vector.load %arg5[%c18, %c0_18] : memref<28x256xf32, #tpu.memory_space<vmem>>, vector<3x256xf32>
    tpu.vector_store %arg5[%c18, %c0_18], %31 {strides = array<i32>} : memref<28x256xf32, #tpu.memory_space<vmem>>, vector<3x256xf32>,
    %c240_i32 = arith.constant 240 : i32
    %33 = tpu.dynamic_rotate %1 by %c240_i32 dim 1 : vector<3x256xf32>, i32 -> vector<3x256xf32>
    %c7 = arith.constant 7 : index
    %c0_19 = arith.constant 0 : index
    %34 = vector.load %arg3[%c7, %c0_19] : memref<9x256xf32, #tpu.memory_space<vmem>>, vector<1x256xf32>
    %35 = vector.broadcast %34 : vector<1x256xf32> to vector<3x256xf32>
    %36 = arith.mulf %33, %35 : vector<3x256xf32>
    %c21 = arith.constant 21 : index
    %c0_20 = arith.constant 0 : index
    %37 = vector.load %arg5[%c21, %c0_20] : memref<28x256xf32, #tpu.memory_space<vmem>>, vector<3x256xf32>
    tpu.vector_store %arg5[%c21, %c0_20], %36 {strides = array<i32>} : memref<28x256xf32, #tpu.memory_space<vmem>>, vector<3x256xf32>,
    %c239_i32 = arith.constant 239 : i32
    %38 = tpu.dynamic_rotate %1 by %c239_i32 dim 1 : vector<3x256xf32>, i32 -> vector<3x256xf32>
    %c8 = arith.constant 8 : index
    %c0_21 = arith.constant 0 : index
    %39 = vector.load %arg3[%c8, %c0_21] : memref<9x256xf32, #tpu.memory_space<vmem>>, vector<1x256xf32>
    %40 = vector.broadcast %39 : vector<1x256xf32> to vector<3x256xf32>
    %41 = arith.mulf %38, %40 : vector<3x256xf32>
    %c24 = arith.constant 24 : index
    %c0_22 = arith.constant 0 : index
    %42 = vector.load %arg5[%c24, %c0_22] : memref<28x256xf32, #tpu.memory_space<vmem>>, vector<3x256xf32>
    tpu.vector_store %arg5[%c24, %c0_22], %41 {strides = array<i32>} : memref<28x256xf32, #tpu.memory_space<vmem>>, vector<3x256xf32>,
    %cst = arith.constant 1.000000e+00 : f32
    %43 = vector.broadcast %cst : f32 to vector<1x256xf32>
    %c27 = arith.constant 27 : index
    %c0_23 = arith.constant 0 : index
    %44 = vector.load %arg5[%c27, %c0_23] : memref<28x256xf32, #tpu.memory_space<vmem>>, vector<1x256xf32>
    tpu.vector_store %arg5[%c27, %c0_23], %43 {strides = array<i32>} : memref<28x256xf32, #tpu.memory_space<vmem>>, vector<1x256xf32>,
    %c0_24 = arith.constant 0 : index
    %c0_25 = arith.constant 0 : index
    %45 = vector.load %arg2[%c0_24, %c0_25] : memref<3x28xf32, #tpu.memory_space<vmem>>, vector<3x28xf32>
    %c0_26 = arith.constant 0 : index
    %c0_27 = arith.constant 0 : index
    %46 = vector.load %arg5[%c0_26, %c0_27] : memref<28x256xf32, #tpu.memory_space<vmem>>, vector<28x256xf32>
    %cst_28 = arith.constant dense<0.000000e+00> : vector<3x256xf32>
    %47 = tpu.matmul %45, %46, %cst_28 {dimension_numbers = #tpu.dot_dimension_numbers<[1], [0], [0], [1], [0, 0, 1, 1], [], []>} : vector<3x28xf32>, vector<28x256xf32>, vector<3x256xf32> -> vector<3x256xf32>
    %c0_29 = arith.constant 0 : index
    %c0_30 = arith.constant 0 : index
    %c0_31 = arith.constant 0 : index
    %48 = vector.load %arg4[%c0_29, %c0_30, %c0_31] : memref<1x3x256xf32, #tpu.memory_space<vmem>>, vector<1x3x256xf32>
    %49 = vector.shape_cast %48 : vector<1x3x256xf32> to vector<3x256xf32>
    %50 = vector.shape_cast %47 : vector<3x256xf32> to vector<1x3x256xf32>
    tpu.vector_store %arg4[%c0_29, %c0_30, %c0_31], %50 {strides = array<i32>} : memref<1x3x256xf32, #tpu.memory_space<vmem>>, vector<1x3x256xf32>,
    return
  }
  func.func @transform_0(%arg0: i32) -> (i32, i32, i32) {
    %c0_i32 = arith.constant 0 : i32
    %c0_i32_0 = arith.constant 0 : i32
    %c0_i32_1 = arith.constant 0 : i32
    return %arg0, %c0_i32, %c0_i32_0 : i32, i32, i32
  }
  func.func @transform_1(%arg0: i32) -> (i32, i32) {
    %c0_i32 = arith.constant 0 : i32
    %c0_i32_0 = arith.constant 0 : i32
    %c0_i32_1 = arith.constant 0 : i32
    return %c0_i32, %c0_i32_0 : i32, i32
  }
  func.func @transform_2(%arg0: i32) -> (i32, i32) {
    %c0_i32 = arith.constant 0 : i32
    %c0_i32_0 = arith.constant 0 : i32
    %c0_i32_1 = arith.constant 0 : i32
    return %c0_i32, %c0_i32_0 : i32, i32
  }
  func.func @transform_3(%arg0: i32) -> (i32, i32, i32) {
    %c0_i32 = arith.constant 0 : i32
    %c0_i32_0 = arith.constant 0 : i32
    %c0_i32_1 = arith.constant 0 : i32
    return %arg0, %c0_i32, %c0_i32_0 : i32, i32, i32
  }
}

</mosaic_0001>

<bundles_post_ra>
// kernel: tpu_custom_call.1
= control target key start
LH: loop header
LB: loop body
LE: loop exit
PB: predicated region body
PF: predicated region fallthrough
CT: control target
= control target key end

     0   :  { %8 = vsyncpa [#allocation4], 0  ;;  %s718_s12 = smov 0   ;;  %s807_s0 = inlined_call_operand.vmem [shape: f32[2,3,256], index: 0, kind: input, shape index: {}]   ;;  %s808_s1 = inlined_call_operand.vmem [shape: f32[3,28], index: 1, kind: input, shape index: {}]   ;;  %s809_s2 = inlined_call_operand.hbm [shape: f32[9,256], index: 2, kind: input, shape index: {}]   ;;  %s810_s3 = inlined_call_operand.vmem [shape: f32[2,3,256], index: 3, kind: output, shape index: {}]  }
   0x1 LB: > { %s597_s13 = sadd.s32 4294967295, %s683_s12   ;;  %p599_p0 = scmp.ge.s32.totalorder %s683_s12, 1  ;;  %s683_s12 = sphi %s718_s12, %s14_s12  }
   0x2   : > { %p113_p1 = scmp.lt.s32.totalorder %s683_s12, 3  ;;  %s685_s14 = smov [#allocation3]  }
   0x3   : > { %s128_s15 = sshll.u32 %s685_s14, 4  ;;  %p623_p3 = scmp.eq.s32.totalorder %s597_s13, 0  ;;  %s129_s15 = int_to_ptr.vmem [resolvable:$true] %s128_s15 }
   0x4   : > { %p726_p2 = pnand %p599_p0, %p113_p1  ;;  %s658_s17 = scalar_lea.vmem %s129_s15, 512 }
   0x5   : > { %p659_p7 = scmp.ne.s32.totalorder %s129_s15, %s658_s17  ;;  %p666_p10 = scmp.lt.s32.totalorder %s129_s15, %s129_s15 }
   0x6   : > { %p619_p4 = pneg %p726_p2  ;;  %p667_p11 = scmp.lt.s32.totalorder %s658_s17, %s658_s17 }
   0x8   : > { %p620_p5 = pnand %p623_p3, %p619_p4  ;;  %p668_p12 = por %p667_p11, %p666_p10 }
   0xa   : > { %p649_p6 = pneg %p620_p5 }
   0xc   : > { %p661_p8 = pnand %p659_p7, %p649_p6 }
   0xe   : > { %p662_p9 = pneg %p661_p8 }
  0x10   : > { %p669_p13 = pnand %p668_p12, %p662_p9 }
  0x12   : > { %672 = shalt.err (!%p669_p13)
}
  0x13   : > { %s686_s18 = smov 256   ;;  %s687_s19 = smov 16  }
  0x14   : > { %622 = dma.hbm_to_vmem [thread:$0]  (!%p620_p5), %s809_s2, 512, %s129_s15, [#allocation4], %s686_s18, %s686_s18, %s687_s19  }
  0x15   : > { %152 = sbr.rel (%p726_p2) target bundleno = 387 (0x183), region = 32 }
  0x1a   : > { %678 = dma.done.wait (%p623_p3), [#allocation4], 512  }
  0x1b   : > { %680 = vsyncadd (%p623_p3), [#allocation4], 4294966784  ;;  %p176_p0 = scmp.lt.s32.totalorder %s597_s13, 1  ;;  %s688_s26 = smov 113   ;;  %v194_v2 = vlaneseq  ;;  %v691_v3 = vmov 1.0   ;;  %v696_v5 = vmov 0.0  }
  0x1c   : > { %s689_s27 = smov 127   ;;  %s690_s28 = smov 112   ;;  %518 = vmatprep.mubr.f32.mxu0 %v696_v5  ;;  %v351_v10 = vld [vmem:[#allocation3 + $0x6] ss:$8 sm:$0x3]  ;;  %vm447_vm7 = vcmask 1043456  }
  0x1d   : > { %s813_s13 = smov (!%p176_p0, %s597_s13), 1  ;;  %vm429_vm0 = vcmp.lt.s32.totalorder %v194_v2, 256  ;;  %s692_s29 = smov 111   ;;  %v202_v6 = vshrl.u32 %v194_v2, 7  ;;  %v748_v7 = vand.u32 127, %v194_v2  ;;  %vm443_vm10 = vcmask 228352  }
  0x1e   : > { %s613_s22 = sshll.u32 %s813_s13, 3  ;;  %432 = vst.msk [vmem:[#allocation2 + $0x33] ss:$8 sm:$0x3] %vm429_vm0, %v691_v3  ;;  %s693_s30 = smov 15  }
  0x1f   : > { %s180_s25 = scalar_lea.vmem %s807_s0, %s613_s22  ;;  %s694_s4 = smov 1   ;;  %v750_v8 = vsub.s32 0, %v202_v6  ;;  %v752_v9 = vsub.s32 1, %v202_v6  ;;  %vm347_vm1 = vcmp.lt.s32.totalorder %v748_v7, 113  ;;  %vm377_vm2 = vcmp.lt.s32.totalorder %v748_v7, 112 }
  0x20   : > { %v186_v0 = vld [vmem:[%s180_s25] sm:$0x77]  ;;  %s695_s5 = smov 16   ;;  %s697_s6 = smov 17   ;;  %vm315_vm3 = vcmp.lt.s32.totalorder %v748_v7, 127  ;;  %vm407_vm4 = vcmp.lt.s32.totalorder %v748_v7, 111 }
  0x21   : > { %343 = vrot.lane.b32.xlu1 %v186_v0, %s688_s26  ;;  %310 = vst [vmem:[#allocation2 + $0x18] sm:$0x70] %v186_v0  ;;  %311 = vrot.lane.b32.xlu0 %v186_v0, %s689_s27  ;;  %v188_v1 = vcombine.high %v186_v0, %v186_v0  ;;  %v307_v4 = vcombine.low %v186_v0, %v186_v0  ;;  %v381_v15 = vld [vmem:[#allocation3 + $0x7] ss:$8 sm:$0x3]  ;;  %vm249_vm5 = vcmp.lt.s32.totalorder %v748_v7, 15  ;;  %s185_s11 = scalar_lea.vmem %s810_s3, %s613_s22 }
  0x22   : > { %v356_v13 = vrot.slane %v351_v10, %v750_v8  ;;  %v360_v14 = vrot.slane %v351_v10, %v752_v9  ;;  %v319_v16 = vld [vmem:[#allocation3 + $0x5] ss:$8 sm:$0x3]  ;;  %v386_v21 = vrot.slane %v381_v15, %v750_v8  ;;  %v390_v22 = vrot.slane %v381_v15, %v752_v9  ;;  %v411_v23 = vld [vmem:[#allocation3 + $0x10] ss:$8 sm:$0x3] }
  0x23   : > { %309 = vst [vmem:[#allocation2 + $0x10] sm:$0x70] %v307_v4  ;;  %v324_v26 = vrot.slane %v319_v16, %v750_v8  ;;  %v328_v27 = vrot.slane %v319_v16, %v752_v9  ;;  %v416_v32 = vrot.slane %v411_v23, %v750_v8  ;;  %v420_v33 = vrot.slane %v411_v23, %v752_v9  ;;  %v253_v42 = vld [vmem:[#allocation3 + $0x2] ss:$8 sm:$0x3] }
  0x24   : > { %v258_v53 = vrot.slane %v253_v42, %v750_v8  ;;  %v262_v54 = vrot.slane %v253_v42, %v752_v9  ;;  %v285_v55 = vld [vmem:[#allocation3 + $0x3] ss:$8 sm:$0x3]  ;;  %vm281_vm6 = vcmp.lt.s32.totalorder %v748_v7, 1  ;;  %vm219_vm8 = vcmp.lt.s32.totalorder %v748_v7, 16 }
  0x25   : > { %373 = vrot.lane.b32.xlu0 %v186_v0, %s690_s28  ;;  %345 = vrot.lane.b32.xlu1 %v188_v1, %s688_s26  ;;  %v290_v62 = vrot.slane %v285_v55, %v750_v8  ;;  %v294_v63 = vrot.slane %v285_v55, %v752_v9  ;;  %vm196_vm9 = vcmp.lt.s32.totalorder %v748_v7, 17 }
  0x29   : > { %375 = vrot.lane.b32.xlu1 %v188_v1, %s690_s28  ;;  %313 = vrot.lane.b32.xlu0 %v188_v1, %s689_s27 }
  0x2d   : > { %405 = vrot.lane.b32.xlu1 %v188_v1, %s692_s29  ;;  %403 = vrot.lane.b32.xlu0 %v186_v0, %s692_s29 }
  0x31   : > { %247 = vrot.lane.b32.xlu1 %v188_v1, %s693_s30  ;;  %245 = vrot.lane.b32.xlu0 %v186_v0, %s693_s30 }
  0x35   : > { %279 = vrot.lane.b32.xlu1 %v188_v1, %s694_s4  ;;  %277 = vrot.lane.b32.xlu0 %v186_v0, %s694_s4 }
  0x39   : > { %217 = vrot.lane.b32.xlu1 %v188_v1, %s695_s5  ;;  %215 = vrot.lane.b32.xlu0 %v186_v0, %s695_s5 }
  0x3d   : > { %192 = vrot.lane.b32.xlu1 %v188_v1, %s697_s6  ;;  %190 = vrot.lane.b32.xlu0 %v186_v0, %s697_s6  ;;  %v223_v0 = vld [vmem:[#allocation3 + $0x1] ss:$8 sm:$0x3] }
  0x93   : > { %v344_v11 = vpop.permute.xlu1 %343  ;;  %v312_v12 = vpop.permute.xlu0 %311 }
  0x97   : > { %v374_v17 = vpop.permute.xlu0 %373  ;;  %v346_v18 = vpop.permute.xlu1 %345 }
  0x98   : > { %v348_v19 = vsel %vm347_vm1, %v344_v11, %v346_v18  ;;  %v349_v20 = vsel %vm347_vm1, %v346_v18, %v344_v11 }
  0x99   : > { %v363_v24 = vmul.f32 %v356_v13, %v348_v19  ;;  %v364_v25 = vmul.f32 %v360_v14, %v349_v20  ;;  %v232_v13 = vrot.slane %v223_v0, %v752_v9  ;;  %v199_v14 = vld [vmem:[#allocation3] ss:$8 sm:$0x3] }
  0x9b   : > { %v367_v28 = vrot.slane %v363_v24, 6  ;;  %v368_v29 = vrot.slane %v364_v25, 6  ;;  %v376_v30 = vpop.permute.xlu1 %375  ;;  %v314_v31 = vpop.permute.xlu0 %313 }
  0x9c   : > { %v378_v34 = vsel %vm377_vm2, %v374_v17, %v376_v30  ;;  %v379_v35 = vsel %vm377_vm2, %v376_v30, %v374_v17  ;;  %v316_v36 = vsel %vm315_vm3, %v312_v12, %v314_v31  ;;  %v317_v37 = vsel %vm315_vm3, %v314_v31, %v312_v12 }
  0x9d   : > { %371 = vst [vmem:[#allocation2 + $0x20] sm:$0x1c] %v367_v28  ;;  %372 = vst [vmem:[#allocation2 + $0x28] sm:$0x1c] %v368_v29  ;;  %v393_v38 = vmul.f32 %v386_v21, %v378_v34  ;;  %v394_v39 = vmul.f32 %v390_v22, %v379_v35  ;;  %v331_v40 = vmul.f32 %v324_v26, %v316_v36 }
  0x9e   : > { %v332_v41 = vmul.f32 %v328_v27, %v317_v37  ;;  %v228_v12 = vrot.slane %v223_v0, %v750_v8  ;;  %v204_v27 = vrot.slane %v199_v14, %v750_v8  ;;  %v208_v28 = vrot.slane %v199_v14, %v752_v9 }
  0x9f   : > { %v397_v43 = vrot.slane %v393_v38, 3  ;;  %v398_v44 = vrot.slane %v394_v39, 3  ;;  %v335_v45 = vrot.slane %v331_v40, 1  ;;  %v406_v47 = vpop.permute.xlu1 %405  ;;  %v404_v48 = vpop.permute.xlu0 %403  ;;  %v434_v38 = vld [vmem:[%s808_s1] sm:$0x7] }
  0xa0   : > { %v336_v46 = vrot.slane %v332_v41, 1  ;;  %v408_v49 = vsel %vm407_vm4, %v404_v48, %v406_v47  ;;  %v409_v50 = vsel %vm407_vm4, %v406_v47, %v404_v48 }
  0xa1   : > { %401 = vst [vmem:[#allocation2 + $0x20] sm:$0xe0] %v397_v43  ;;  %402 = vst [vmem:[#allocation2 + $0x28] sm:$0xe0] %v398_v44  ;;  %v423_v51 = vmul.f32 %v416_v32, %v408_v49  ;;  %v424_v52 = vmul.f32 %v420_v33, %v409_v50 }
  0xa2   : > { %339 = vst [vmem:[#allocation2 + $0x20] ss:$-12 sps:$4 sm:$0x83] %v335_v45   ;;  %340 = vst [vmem:[#allocation2 + $0x28] ss:$-12 sps:$4 sm:$0x83] %v336_v46  }
  0xa3   : > { %425 = vst [vmem:[#allocation2 + $0x30] sm:$0x7] %v423_v51  ;;  %426 = vst [vmem:[#allocation2 + $0x38] sm:$0x7] %v424_v52  ;;  %v248_v56 = vpop.permute.xlu1 %247  ;;  %v246_v57 = vpop.permute.xlu0 %245 }
  0xa4   : > { %v250_v58 = vsel %vm249_vm5, %v246_v57, %v248_v56  ;;  %v251_v59 = vsel %vm249_vm5, %v248_v56, %v246_v57 }
  0xa5   : > { %v265_v60 = vmul.f32 %v258_v53, %v251_v59  ;;  %v266_v61 = vmul.f32 %v262_v54, %v250_v58 }
  0xa7   : > { %v269_v1 = vrot.slane %v265_v60, 2  ;;  %v270_v2 = vrot.slane %v266_v61, 2  ;;  %v280_v3 = vpop.permute.xlu1 %279  ;;  %v278_v4 = vpop.permute.xlu0 %277 }
  0xa8   : > { %v282_v5 = vsel %vm281_vm6, %v278_v4, %v280_v3  ;;  %v283_v6 = vsel %vm281_vm6, %v280_v3, %v278_v4 }
  0xa9   : > { %273 = vst [vmem:[#allocation2 + $0x10] ss:$-12 sps:$4 sm:$0xc1] %v269_v1   ;;  %274 = vst [vmem:[#allocation2 + $0x18] ss:$-12 sps:$4 sm:$0xc1] %v270_v2   ;;  %v297_v10 = vmul.f32 %v290_v62, %v283_v6  ;;  %v298_v11 = vmul.f32 %v294_v63, %v282_v5 }
  0xaa   : > { %v442_v15 = vld [vmem:[#allocation2 + $0x38] sm:$0xf]  ;;  %v441_v16 = vld [vmem:[#allocation2 + $0x30] sm:$0xf]  ;;  %v440_v23 = vld [vmem:[#allocation2 + $0x28] sm:$0xff] }
  0xab   : > { %v301_v17 = vrot.slane %v297_v10, 7  ;;  %v302_v18 = vrot.slane %v298_v11, 7  ;;  %v218_v19 = vpop.permute.xlu1 %217  ;;  %608 = vmatprep.subr.msk.mxu0 %vm447_vm7, %v442_v15  ;;  %v216_v20 = vpop.permute.xlu0 %215  ;;  %v439_v26 = vld [vmem:[#allocation2 + $0x20] sm:$0xff] }
  0xac   : > { %v220_v21 = vsel %vm219_vm8, %v216_v20, %v218_v19  ;;  %v221_v22 = vsel %vm219_vm8, %v218_v19, %v216_v20  ;;  %609 = vmatpush1.msk.msra.mxu0 %vm447_vm7, %v441_v16 }
  0xad   : > { %305 = vst [vmem:[#allocation2 + $0x10] sm:$0xe] %v301_v17  ;;  %306 = vst [vmem:[#allocation2 + $0x18] sm:$0xe] %v302_v18  ;;  %v235_v24 = vmul.f32 %v228_v12, %v221_v22  ;;  %v236_v25 = vmul.f32 %v232_v13, %v220_v21  ;;  %480 = vmatprep.subr.mxu0 %v440_v23 }
  0xae   : > { %481 = vmatpush1.msra.mxu0 %v439_v26 }
  0xaf   : > { %v239_v29 = vrot.slane %v235_v24, 5  ;;  %v240_v30 = vrot.slane %v236_v25, 5  ;;  %v193_v31 = vpop.permute.xlu1 %192  ;;  %v191_v32 = vpop.permute.xlu0 %190 }
  0xb0   : > { %v197_v33 = vsel %vm196_vm9, %v191_v32, %v193_v31  ;;  %v198_v34 = vsel %vm196_vm9, %v193_v31, %v191_v32 }
  0xb1   : > { %243 = vst [vmem:[#allocation2] sm:$0x38] %v239_v29  ;;  %244 = vst [vmem:[#allocation2 + $0x8] sm:$0x38] %v240_v30  ;;  %v211_v7 = vmul.f32 %v204_v27, %v198_v34  ;;  %v212_v35 = vmul.f32 %v208_v28, %v197_v33 }
  0xb3   : > { %213 = vst [vmem:[#allocation2] sm:$0x7] %v211_v7  ;;  %214 = vst [vmem:[#allocation2 + $0x8] sm:$0x7] %v212_v35 }
  0xb4   : > { %v438_v36 = vld [vmem:[#allocation2 + $0x18] sm:$0xff]  ;;  %v437_v37 = vld [vmem:[#allocation2 + $0x10] sm:$0xff] }
  0xb5   : > { %482 = vmatprep.subr.mxu0 %v438_v36 }
  0xb6   : > { %483 = vmatpush1.msra.mxu0 %v437_v37 }
  0xba   : > { %v436_v8 = vld [vmem:[#allocation2 + $0x8] sm:$0xff]  ;;  %v435_v9 = vld [vmem:[#allocation2] sm:$0xff] }
  0xbb   : > { %484 = vmatprep.subr.mxu0 %v436_v8 }
  0xbc   : > { %485 = vmatpush1.msra.mxu0 %v435_v9 }
  0xbd   : > { %610 = vmatmul.mubr.msk.f32.vlgmr.msra.gmra.mxu0 %vm443_vm10, %v434_v38 }
 0x17d   : > { %v520_v39 = vpop.f32.mrf.mxu0 }
 0x17f   : > { %v522_v40 = vpop.f32.mrf.mxu0 }
 0x180   : > { %v527_v41 = vcombine.low %v520_v39, %v522_v40 }
 0x182   : > { %529 = vst [vmem:[%s185_s11] sm:$0x77] %v527_v41 }
 0x183 PF: > { %s14_s12 = sadd.s32 1, %s683_s12  }
 0x184   : > { %p11_p1 = scmp.ge.s32.totalorder %s14_s12, 4  }
 0x186   :  { %13 = sbr.rel (!%p11_p1) target bundleno = 1 (0x1), region = 75 }
 0x18b   :  { %551 = vsyncpa [#allocation4], 1 }
 0x18c   :  { %553 = vsyncpa [#allocation4 + $0x1], 1 }

</bundles_post_ra>
